<compile_context>
chip_gen: v7x
topology: tpu7x:2x2x1
jax: 0.10.0
libtpu: 0.0.40
codegen_flags: <defaults>
</compile_context>

<pallas_src>
import functools
import math

import jax
import jax.numpy as jnp
from jax.experimental import pallas as pl
from jax.experimental.pallas import tpu as pltpu


def _round_up(a, m):
    return (a + m - 1) // m * m


def _classifier_kernel(x_ref, w1_ref, b1_ref, w2_ref, o_ref, *, inv_temp):
    # fc1: x @ W1 + b1  -- bf16 operands on the MXU, f32 accumulation.
    h = jnp.dot(x_ref[...], w1_ref[...], preferred_element_type=jnp.float32)
    h = h + b1_ref[...]                       # b1 is (1, H) f32, broadcasts over rows

    # grad_reverse(x, eta) is identity in the forward pass -> nothing to do.
    # TODO(synk): backward-pass gradient scaling of GradientReverse is not
    # represented (forward-only kernel).

    # F.normalize(h, p=2, dim=1, eps=1e-12): h / max(||h||, eps).
    # Single EUP rsqrt on sum of squares (eps^2 clamp is equivalent), and fold the
    # 1/temp scale of fc2's output into the per-row factor (fc2 is linear).
    ssq = jnp.sum(h * h, axis=-1, keepdims=True)
    inv = jax.lax.rsqrt(jnp.maximum(ssq, 1e-24)) * inv_temp
    h_n = (h * inv).astype(w2_ref.dtype)      # back to bf16 for the second MXU matmul

    # fc2 (no bias); /temp already folded into `inv`.
    out = jnp.dot(h_n, w2_ref[...], preferred_element_type=jnp.float32)
    o_ref[...] = out.astype(o_ref.dtype)


def classifier_deep_forward(x, w1, b1, w2, *, temp=0.05, tb=256):
    """Forward of Classifier_deep.

    x:  [B, inc]  float
    w1: [inc, H]  (fc1 weight, pre-transposed so kernel does x @ w1)
    b1: [H]
    w2: [H, C]    (fc2 weight, pre-transposed; no bias)
    returns [B, C] float32 logits.

    tb: batch tile (use ~256 on v6e/v7x, ~128 on v5e). Weights stay resident
    across the grid; only x/out blocks stream.
    """
    B, inc = x.shape
    H = w1.shape[1]
    C = w2.shape[1]

    # --- pad batch to a sublane-friendly tile and num_class to a lane-dense 128 ---
    Bp = _round_up(B, 8)
    TB = min(tb, Bp)
    Bp = _round_up(Bp, TB)
    Cp = _round_up(C, 128)

    x_p = jnp.pad(x, ((0, Bp - B), (0, 0))).astype(jnp.bfloat16)
    w1_b = w1.astype(jnp.bfloat16)
    w2_p = jnp.pad(w2, ((0, 0), (0, Cp - C))).astype(jnp.bfloat16)
    b1_2d = b1.reshape(1, H).astype(jnp.float32)

    kernel = functools.partial(_classifier_kernel, inv_temp=float(1.0 / temp))

    cost = pl.CostEstimate(
        flops=2 * Bp * inc * H + 2 * Bp * H * Cp,
        transcendentals=Bp,  # one rsqrt per row
        bytes_accessed=(Bp * inc * 2 + inc * H * 2 + H * 4
                        + H * Cp * 2 + Bp * Cp * 4),
    )

    out_p = pl.pallas_call(
        kernel,
        out_shape=jax.ShapeDtypeStruct((Bp, Cp), jnp.float32),
        grid_spec=pltpu.PrefetchScalarGridSpec(
            num_scalar_prefetch=0,
            grid=(Bp // TB,),
            in_specs=[
                pl.BlockSpec((TB, inc), lambda i: (i, 0)),   # x: streams per batch tile
                pl.BlockSpec((inc, H), lambda i: (0, 0)),    # w1: resident
                pl.BlockSpec((1, H), lambda i: (0, 0)),      # b1: resident
                pl.BlockSpec((H, Cp), lambda i: (0, 0)),     # w2: resident
            ],
            out_specs=pl.BlockSpec((TB, Cp), lambda i: (i, 0)),
        ),
        compiler_params=pltpu.CompilerParams(
            dimension_semantics=("parallel",)),               # megacore-shardable grid
        cost_estimate=cost,
    )(x_p, w1_b, b1_2d, w2_p)

    return out_p[:B, :C]


def _xavier_normal(key, fan_out, fan_in):
    # matches nn.init.xavier_normal_ for a (fan_out, fan_in) Linear weight
    std = math.sqrt(2.0 / (fan_in + fan_out))
    return std * jax.random.normal(key, (fan_out, fan_in), dtype=jnp.float32)


if __name__ == "__main__":
    # Small shapes consistent with the module (inc -> 512-ish hidden -> num_class),
    # scaled down for the smoke test.
    B, INC, HID, NUM_CLASS = 8, 256, 128, 64
    TEMP = 0.05

    key = jax.random.PRNGKey(0)
    kx, k1, k2 = jax.random.split(key, 3)

    x = jax.random.normal(kx, (B, INC), dtype=jnp.float32)

    # Deterministic parameter init mirroring weights_init:
    #   Linear -> xavier_normal_(weight), zeros_(bias); fc2 has no bias.
    w1_t = _xavier_normal(k1, HID, INC)           # torch layout (out, in)
    b1 = jnp.zeros((HID,), dtype=jnp.float32)
    w2_t = _xavier_normal(k2, NUM_CLASS, HID)

    # Pre-transpose so the kernel computes x @ W^T as plain matmuls.
    w1 = w1_t.T                                   # [INC, HID]
    w2 = w2_t.T                                   # [HID, NUM_CLASS]

    out = classifier_deep_forward(x, w1, b1, w2, temp=TEMP)
    out = jax.block_until_ready(out)

    # Pure-JAX f32 reference (same semantics as the PyTorch forward). The kernel
    # feeds the MXU bf16 operands, so compare with a tolerance that covers bf16
    # operand quantization (~1% relative on these magnitudes).
    h_ref = x @ w1 + b1
    h_ref = h_ref / jnp.maximum(
        jnp.linalg.norm(h_ref, axis=1, keepdims=True), 1e-12)
    ref = (h_ref @ w2) / TEMP

    assert out.shape == (B, NUM_CLASS)
    assert bool(jnp.all(jnp.isfinite(out)))
    assert jnp.allclose(out, ref, atol=5e-2, rtol=5e-2)

    print("KERNEL_OK")
</pallas_src>

<mosaic_0001>
module attributes {stable_mosaic.version = 11 : i64} {
  func.func @_classifier_kernel(%arg0: i32, %arg1: memref<8x256xbf16, #tpu.memory_space<vmem>>, %arg2: memref<256x128xbf16, #tpu.memory_space<vmem>>, %arg3: memref<1x128xf32, #tpu.memory_space<vmem>>, %arg4: memref<128x128xbf16, #tpu.memory_space<vmem>>, %arg5: memref<8x128xf32, #tpu.memory_space<vmem>>) attributes {dimension_semantics = [#tpu.dimension_semantics<parallel>], iteration_bounds = array<i64: 1>, scalar_prefetch = 0 : i64, scratch_operands = 0 : i64, tpu.core_type = #tpu.core_type<tc>, window_params = [{transform_indices = @transform_0, window_bounds = array<i64: 8, 256>}, {pipeline_mode = #tpu.pipeline_mode<synchronous>, transform_indices = @transform_1, window_bounds = array<i64: 256, 128>}, {pipeline_mode = #tpu.pipeline_mode<synchronous>, transform_indices = @transform_2, window_bounds = array<i64: 1, 128>}, {pipeline_mode = #tpu.pipeline_mode<synchronous>, transform_indices = @transform_3, window_bounds = array<i64: 128, 128>}, {transform_indices = @transform_4, window_bounds = array<i64: 8, 128>}]} {
    %c0 = arith.constant 0 : index
    %c0_0 = arith.constant 0 : index
    %0 = vector.load %arg1[%c0, %c0_0] : memref<8x256xbf16, #tpu.memory_space<vmem>>, vector<8x256xbf16>
    %c0_1 = arith.constant 0 : index
    %c0_2 = arith.constant 0 : index
    %1 = vector.load %arg2[%c0_1, %c0_2] : memref<256x128xbf16, #tpu.memory_space<vmem>>, vector<256x128xbf16>
    %cst = arith.constant dense<0.000000e+00> : vector<8x128xf32>
    %2 = tpu.matmul %0, %1, %cst {dimension_numbers = #tpu.dot_dimension_numbers<[1], [0], [0], [1], [0, 0, 1, 1], [], []>} : vector<8x256xbf16>, vector<256x128xbf16>, vector<8x128xf32> -> vector<8x128xf32>
    %c0_3 = arith.constant 0 : index
    %c0_4 = arith.constant 0 : index
    %3 = vector.load %arg3[%c0_3, %c0_4] : memref<1x128xf32, #tpu.memory_space<vmem>>, vector<1x128xf32>
    %4 = vector.broadcast %3 : vector<1x128xf32> to vector<8x128xf32>
    %5 = arith.addf %2, %4 : vector<8x128xf32>
    %6 = arith.mulf %5, %5 : vector<8x128xf32>
    %cst_5 = arith.constant dense<0.000000e+00> : vector<8xf32>
    %7 = vector.multi_reduction <add>, %6, %cst_5 [1] : vector<8x128xf32> to vector<8xf32>
    %8 = vector.shape_cast %7 : vector<8xf32> to vector<8x1xf32>
    %cst_6 = arith.constant 1.000000e-24 : f32
    %9 = vector.broadcast %cst_6 : f32 to vector<8x1xf32>
    %10 = arith.maximumf %8, %9 : vector<8x1xf32>
    %11 = math.rsqrt %10 : vector<8x1xf32>
    %cst_7 = arith.constant 2.000000e+01 : f32
    %12 = vector.broadcast %cst_7 : f32 to vector<8x1xf32>
    %13 = arith.mulf %11, %12 : vector<8x1xf32>
    %14 = vector.broadcast %13 : vector<8x1xf32> to vector<8x128xf32>
    %15 = arith.mulf %5, %14 : vector<8x128xf32>
    %16 = arith.truncf %15 : vector<8x128xf32> to vector<8x128xbf16>
    %c0_8 = arith.constant 0 : index
    %c0_9 = arith.constant 0 : index
    %17 = vector.load %arg4[%c0_8, %c0_9] : memref<128x128xbf16, #tpu.memory_space<vmem>>, vector<128x128xbf16>
    %cst_10 = arith.constant dense<0.000000e+00> : vector<8x128xf32>
    %18 = tpu.matmul %16, %17, %cst_10 {dimension_numbers = #tpu.dot_dimension_numbers<[1], [0], [0], [1], [0, 0, 1, 1], [], []>} : vector<8x128xbf16>, vector<128x128xbf16>, vector<8x128xf32> -> vector<8x128xf32>
    %c0_11 = arith.constant 0 : index
    %c0_12 = arith.constant 0 : index
    %19 = vector.load %arg5[%c0_11, %c0_12] : memref<8x128xf32, #tpu.memory_space<vmem>>, vector<8x128xf32>
    tpu.vector_store %arg5[%c0_11, %c0_12], %18 {strides = array<i32>} : memref<8x128xf32, #tpu.memory_space<vmem>>, vector<8x128xf32>,
    return
  }
  func.func @transform_0(%arg0: i32) -> (i32, i32) {
    %c0_i32 = arith.constant 0 : i32
    %c0_i32_0 = arith.constant 0 : i32
    return %arg0, %c0_i32 : i32, i32
  }
  func.func @transform_1(%arg0: i32) -> (i32, i32) {
    %c0_i32 = arith.constant 0 : i32
    %c0_i32_0 = arith.constant 0 : i32
    %c0_i32_1 = arith.constant 0 : i32
    return %c0_i32, %c0_i32_0 : i32, i32
  }
  func.func @transform_2(%arg0: i32) -> (i32, i32) {
    %c0_i32 = arith.constant 0 : i32
    %c0_i32_0 = arith.constant 0 : i32
    %c0_i32_1 = arith.constant 0 : i32
    return %c0_i32, %c0_i32_0 : i32, i32
  }
  func.func @transform_3(%arg0: i32) -> (i32, i32) {
    %c0_i32 = arith.constant 0 : i32
    %c0_i32_0 = arith.constant 0 : i32
    %c0_i32_1 = arith.constant 0 : i32
    return %c0_i32, %c0_i32_0 : i32, i32
  }
  func.func @transform_4(%arg0: i32) -> (i32, i32) {
    %c0_i32 = arith.constant 0 : i32
    %c0_i32_0 = arith.constant 0 : i32
    return %arg0, %c0_i32 : i32, i32
  }
}

</mosaic_0001>

<bundles_post_ra>
// kernel: tpu_custom_call.1
= control target key start
LH: loop header
LB: loop body
LE: loop exit
PB: predicated region body
PF: predicated region fallthrough
CT: control target
= control target key end

     0   :  { %9 = vsyncpa [#allocation3], 0  ;;  %s668_s0 = inlined_call_operand.hbm [shape: bf16[8,256], index: 0, kind: input, shape index: {}]   ;;  %s669_s1 = inlined_call_operand.hbm [shape: bf16[256,128], index: 1, kind: input, shape index: {}]   ;;  %s670_s2 = inlined_call_operand.vmem [shape: f32[1,128], index: 2, kind: input, shape index: {}]   ;;  %s671_s3 = inlined_call_operand.hbm [shape: bf16[128,128], index: 3, kind: input, shape index: {}]   ;;  %s672_s4 = inlined_call_operand.hbm [shape: f32[8,128], index: 4, kind: output, shape index: {}]  }
   0x1   :  { %10 = vsyncpa [#allocation6], 0 }
   0x2   :  { %11 = vsyncpa [#allocation4], 0  ;;  %s578_s15 = smov [#allocation5]   ;;  %s484_s19 = scalar_lea.hbm %s669_s1, 2048 }
   0x3   :  { %s27_s16 = sshll.u32 %s578_s15, 4  ;;  %p485_p0 = scmp.ne.s32.totalorder %s669_s1, %s484_s19  ;;  %s28_s16 = int_to_ptr.vmem [resolvable:$true] %s27_s16 }
   0x4   :  { %p488_p1 = scmp.lt.u32.totalorder %s484_s19, %s669_s1 }
   0x6   :  { %p490_p2 = pnand %p488_p1, %p485_p0 }
   0x8   :  { %493 = shalt.err (!%p490_p2)
}
   0x9   :  { %s494_s24 = scalar_lea.vmem %s28_s16, 2048  ;;  %p499_p4 = scmp.lt.s32.totalorder %s28_s16, %s28_s16 }
   0xa   :  { %p495_p3 = scmp.ne.s32.totalorder %s28_s16, %s494_s24  ;;  %p500_p5 = scmp.lt.s32.totalorder %s494_s24, %s494_s24 }
   0xc   :  { %p501_p6 = por %p500_p5, %p499_p4 }
   0xe   :  { %p502_p7 = pnand %p501_p6, %p495_p3 }
  0x10   :  { %505 = shalt.err (!%p502_p7)
}
  0x11   :  { %s579_s25 = smov 64   ;;  %s580_s26 = smov 4  }
  0x12   :  { %33 = dma.hbm_to_vmem [thread:$0]  %s669_s1, 2048, %s28_s16, [#allocation6], %s579_s25, %s579_s25, %s580_s26  }
  0x13   :  { %s581_s29 = smov [#allocation2]   ;;  %s582_s5 = smov [#allocation7]  }
  0x14   :  { %s18_s30 = sshll.u32 %s581_s29, 4  ;;  %s41_s6 = sshll.u32 %s582_s5, 4  ;;  %s19_s30 = int_to_ptr.vmem [resolvable:$true] %s18_s30  ;;  %s42_s6 = int_to_ptr.vmem [resolvable:$true] %s41_s6 }
  0x15   :  { %s506_s9 = scalar_lea.hbm %s668_s0, 128 }
  0x16   :  { %p507_p8 = scmp.ne.s32.totalorder %s668_s0, %s506_s9  ;;  %p510_p9 = scmp.lt.u32.totalorder %s506_s9, %s668_s0 }
  0x18   :  { %p512_p10 = pnand %p510_p9, %p507_p8 }
  0x1a   :  { %515 = shalt.err (!%p512_p10)
}
  0x1b   :  { %s516_s1 = scalar_lea.vmem %s19_s30, 128  ;;  %p521_p12 = scmp.lt.s32.totalorder %s19_s30, %s19_s30 }
  0x1c   :  { %p517_p11 = scmp.ne.s32.totalorder %s19_s30, %s516_s1  ;;  %p522_p13 = scmp.lt.s32.totalorder %s516_s1, %s516_s1 }
  0x1e   :  { %p523_p0 = por %p522_p13, %p521_p12 }
  0x20   :  { %p524_p1 = pnand %p523_p0, %p517_p11 }
  0x22   :  { %527 = shalt.err (!%p524_p1)
}
  0x23   :  { %21 = dma.hbm_to_vmem [thread:$0]  %s668_s0, 128, %s19_s30, [#allocation3]  }
  0x24   :  { %s528_s18 = scalar_lea.hbm %s671_s3, 1024 }
  0x25   :  { %p529_p2 = scmp.ne.s32.totalorder %s671_s3, %s528_s18  ;;  %p532_p3 = scmp.lt.u32.totalorder %s528_s18, %s671_s3 }
  0x27   :  { %p534_p4 = pnand %p532_p3, %p529_p2 }
  0x29   :  { %537 = shalt.err (!%p534_p4)
}
  0x2a   :  { %s538_s23 = scalar_lea.vmem %s42_s6, 1024  ;;  %p543_p6 = scmp.lt.s32.totalorder %s42_s6, %s42_s6 }
  0x2b   :  { %p539_p5 = scmp.ne.s32.totalorder %s42_s6, %s538_s23  ;;  %p544_p7 = scmp.lt.s32.totalorder %s538_s23, %s538_s23 }
  0x2d   :  { %p545_p8 = por %p544_p7, %p543_p6 }
  0x2f   :  { %p546_p9 = pnand %p545_p8, %p539_p5 }
  0x31   :  { %549 = shalt.err (!%p546_p9)
}
  0x32   :  { %47 = dma.hbm_to_vmem [thread:$0]  %s671_s3, 1024, %s42_s6, [#allocation6], %s579_s25, %s579_s25, %s580_s26  }
  0x33   :  { %572 = dma.done.wait [#allocation3], 128  }
  0x34   :  { %573 = vsyncadd [#allocation3], 4294967168 }
  0x35   :  { %574 = dma.done.wait [#allocation6], 3072  }
  0x36   :  { %575 = vsyncadd [#allocation6], 4294964224  ;;  %v456_v0 = vld [vmem:[#allocation5 + $0x40] sm:$0xff]   ;;  %v458_v2 = vld [vmem:[#allocation5 + $0x48] sm:$0xff]   ;;  %v583_v20 = vmov 0.0   ;;  %vm584_vm0 = vmmov 0  }
  0x37   :  { %v457_v1 = vld [vmem:[#allocation5] sm:$0xff]   ;;  %397 = vmatprep.subr.bf16.mxu0 %v456_v0  ;;  %v459_v3 = vld [vmem:[#allocation5 + $0x8] sm:$0xff]   ;;  %v460_v4 = vld [vmem:[#allocation5 + $0x50] sm:$0xff]   ;;  %428 = vmatprep.subr.bf16.mxu1 %v583_v20 }
  0x38   :  { %398 = vmatpush3.bf16.msra.mxu0 %v457_v1  ;;  %v461_v5 = vld [vmem:[#allocation5 + $0x10] sm:$0xff]   ;;  %v462_v6 = vld [vmem:[#allocation5 + $0x58] sm:$0xff]   ;;  %v464_v8 = vld [vmem:[#allocation5 + $0x60] sm:$0xff]   ;;  %444 = vmatprep.mubr.msk.bf16.mxu1 %vm584_vm0, %v583_v20 }
  0x39   :  { %399 = vmatprep.subr.bf16.mxu0 %v458_v2  ;;  %v463_v7 = vld [vmem:[#allocation5 + $0x18] sm:$0xff]   ;;  %v465_v9 = vld [vmem:[#allocation5 + $0x20] sm:$0xff]   ;;  %v466_v10 = vld [vmem:[#allocation5 + $0x68] sm:$0xff]  }
  0x3a   :  { %v58_v11 = vld [vmem:[#allocation2] sm:$0xff]  ;;  %v467_v12 = vld [vmem:[#allocation5 + $0x28] sm:$0xff]   ;;  %v468_v14 = vld [vmem:[#allocation5 + $0x70] sm:$0xff]  }
  0x3b   :  { %v372_v13 = vcombine.high %v58_v11, %v58_v11  ;;  %v469_v15 = vld [vmem:[#allocation5 + $0x30] sm:$0xff]   ;;  %v470_v16 = vld [vmem:[#allocation5 + $0x78] sm:$0xff]   ;;  %v371_v18 = vcombine.low %v58_v11, %v58_v11  ;;  %v474_v19 = vld [vmem:[#allocation7] sm:$0xff]  }
  0x3c   :  { %400 = vmatpush3.bf16.msra.mxu0 %v459_v3  ;;  %v471_v17 = vld [vmem:[#allocation5 + $0x38] sm:$0xff]   ;;  %429 = vmatpush3.bf16.msra.mxu1 %v474_v19  ;;  %v475_v21 = vld [vmem:[#allocation7 + $0x8] sm:$0xff]   ;;  %v476_v22 = vld [vmem:[#allocation7 + $0x10] sm:$0xff]  }
  0x3d   :  { %401 = vmatprep.subr.bf16.mxu0 %v460_v4  ;;  %233 = vmatprep.mubr.bf16.mxu0 %v372_v13  ;;  %v370_v25 = vld [vmem:[%s670_s2] ss:$0 sm:$0xff]  ;;  %v478_v32 = vld [vmem:[#allocation7 + $0x20] sm:$0xff]   ;;  %v479_v33 = vld [vmem:[#allocation7 + $0x28] sm:$0xff]   ;;  %s585_s2 = smov [#allocation8]  }
  0x3e   :  { %430 = vmatprep.subr.bf16.mxu1 %v583_v20  ;;  %v477_v31 = vld [vmem:[#allocation7 + $0x18] sm:$0xff]   ;;  %v480_v34 = vld [vmem:[#allocation7 + $0x30] sm:$0xff]   ;;  %s360_s26 = sshll.u32 %s585_s2, 4  ;;  %s361_s26 = int_to_ptr.vmem [resolvable:$true] %s360_s26 }
  0x3f   :  { %v481_v35 = vld [vmem:[#allocation7 + $0x38] sm:$0xff]   ;;  %s550_s27 = scalar_lea.vmem %s361_s26, 128  ;;  %p555_p11 = scmp.lt.s32.totalorder %s361_s26, %s361_s26 }
  0x40   :  { %402 = vmatpush3.bf16.msra.mxu0 %v461_v5  ;;  %431 = vmatpush3.bf16.msra.mxu1 %v475_v21  ;;  %p551_p10 = scmp.ne.s32.totalorder %s361_s26, %s550_s27  ;;  %p556_p12 = scmp.lt.s32.totalorder %s550_s27, %s550_s27 }
  0x41   :  { %403 = vmatprep.subr.bf16.mxu0 %v462_v6  ;;  %432 = vmatprep.subr.bf16.mxu1 %v583_v20 }
  0x42   :  { %p557_p13 = por %p556_p12, %p555_p11 }
  0x44   :  { %404 = vmatpush3.bf16.msra.mxu0 %v463_v7  ;;  %433 = vmatpush3.bf16.msra.mxu1 %v476_v22  ;;  %p558_p0 = pnand %p557_p13, %p551_p10 }
  0x45   :  { %405 = vmatprep.subr.bf16.mxu0 %v464_v8  ;;  %434 = vmatprep.subr.bf16.mxu1 %v583_v20 }
  0x48   :  { %406 = vmatpush3.bf16.msra.mxu0 %v465_v9  ;;  %435 = vmatpush3.bf16.msra.mxu1 %v477_v31 }
  0x49   :  { %407 = vmatprep.subr.bf16.mxu0 %v466_v10  ;;  %436 = vmatprep.subr.bf16.mxu1 %v583_v20 }
  0x4c   :  { %408 = vmatpush3.bf16.msra.mxu0 %v467_v12  ;;  %437 = vmatpush3.bf16.msra.mxu1 %v478_v32 }
  0x4d   :  { %409 = vmatprep.subr.bf16.mxu0 %v468_v14  ;;  %438 = vmatprep.subr.bf16.mxu1 %v583_v20 }
  0x50   :  { %410 = vmatpush3.bf16.msra.mxu0 %v469_v15  ;;  %439 = vmatpush3.bf16.msra.mxu1 %v479_v33 }
  0x51   :  { %411 = vmatprep.subr.bf16.mxu0 %v470_v16  ;;  %440 = vmatprep.subr.bf16.mxu1 %v583_v20 }
  0x54   :  { %412 = vmatpush3.bf16.msra.mxu0 %v471_v17  ;;  %441 = vmatpush3.bf16.msra.mxu1 %v480_v34 }
  0x55   :  { %442 = vmatprep.subr.bf16.mxu1 %v583_v20 }
  0x57   :  { %234 = vmatmul.mubr.bf16.vlgmr.msra.gmra.mrb[0].mxu0 %v371_v18 }
  0x58   :  { %443 = vmatpush3.bf16.msra.mxu1 %v481_v35 }
 0x12a   :  { %v413_v23 = vpop.f32.mrb[0].mxu0 }
 0x12b   :  { %v414_v24 = vpop.f32.mrb[1].mxu0 }
 0x12c   :  { %v415_v26 = vadd.f32 %v414_v24, %v413_v23  ;;  %v416_v27 = vpop.f32.mrb[2].mxu0 }
 0x12d   :  { %v417_v28 = vpop.f32.mrb[3].mxu0 }
 0x12e   :  { %v236_v29 = vadd.f32 %v415_v26, %v370_v25 }
 0x130   :  { %v241_v30 = vmul.f32 %v236_v29, %v236_v29 }
 0x132   :  { %242 = vadd.xlane.f32.xlu0 %v241_v30 }
 0x1bf   :  { %v243_v36 = vpop.xlane.xlu0 %242 }
 0x1c0   :  { %v244_v37 = vmax.f32 %v243_v36, 1e-24 }
 0x1c2   :  { %482 = vrsqrt.f32 %v244_v37 }
 0x1cc   :  { %v483_v38 = vpop.eup %482 }
 0x1cd   :  { %v246_v39 = vmul.f32 20.0, %v483_v38 }
 0x1cf   :  { %v247_v40 = vmul.f32 %v246_v39, %v236_v29 }
 0x1d1   :  { %v248_v41 = vpack.c.bf16 %v247_v40, %v247_v40 }
 0x1d3   :  { %445 = vmatmul.mubr.bf16.vlgmr.msra.gmra.mrb[0].mxu1 %v248_v41 }
 0x2a6   :  { %v347_v42 = vpop.f32.mrb[0].mxu1 }
 0x2a7   :  { %353 = vst [vmem:[#allocation8] sm:$0xff] %v347_v42  ;;  %v446_v43 = vpop.f32.mrb[1].mxu1 }
 0x2a8   :  { %v350_v44 = vpop.f32.mrb[2].mxu1 }
 0x2a9   :  { %561 = shalt.err (!%p558_p0)
}
 0x2aa   :  { %s562_s30 = scalar_lea.hbm %s672_s4, 128 }
 0x2ab   :  { %p563_p1 = scmp.ne.s32.totalorder %s672_s4, %s562_s30  ;;  %p566_p2 = scmp.lt.u32.totalorder %s562_s30, %s672_s4 }
 0x2ad   :  { %p568_p3 = pnand %p566_p2, %p563_p1 }
 0x2af   :  { %571 = shalt.err (!%p568_p3)
}
 0x2b0   :  { %363 = dma.vmem_to_hbm [thread:$0]  %s361_s26, 128, %s672_s4, [#allocation4]   ;;  %v447_v45 = vpop.f32.mrb[3].mxu1 }
 0x2b1   :  { %576 = dma.done.wait [#allocation4], 128  }
 0x2b2   :  { %577 = vsyncadd [#allocation4], 4294967168 }
 0x2b3   :  { %367 = vsyncpa [#allocation3], 1 }
 0x2b4   :  { %368 = vsyncpa [#allocation6], 1 }
 0x2b5   :  { %369 = vsyncpa [#allocation4], 1 }

</bundles_post_ra>
